<compile_context>
chip_gen: v7x
topology: tpu7x:2x2x1
jax: 0.10.0
libtpu: 0.0.40
codegen_flags: <defaults>
</compile_context>

<pallas_src>
import numpy as np
import jax
import jax.numpy as jnp
from jax.experimental import pallas as pl
from jax.experimental.pallas import tpu as pltpu


def _loss_kernel(pred_ref, q_ref, t_ref, psig_ref, y_ref, mask_ref, bce_ref):
    pred = pred_ref[...]                       # [TB, S, Q] f32
    qn = q_ref[...]                            # [TB, S] i32 (datas[0] shifted left by 1)
    tn = t_ref[...]                            # [TB, S] i32 (datas[2] shifted left by 1)
    _, _, Q = pred.shape

    # qshft = clamp(q - 1, min=0)
    idx = jnp.maximum(qn - 1, 0)               # [TB, S]

    # Gather pred[b, t, idx[b, t]] along the lane (question) axis:
    # boolean select against a (1,1,Q) iota, then lane-reduce (XLU).
    lane = jax.lax.broadcasted_iota(jnp.int32, (1, 1, Q), 2)
    hit = lane == idx[:, :, None]              # [TB, S, Q] bool
    x = jnp.sum(jnp.where(hit, pred, 0.0), axis=-1)        # logits [TB, S]

    mask = tn >= 1                             # padded last column is always 0 -> False
    maskf = mask.astype(jnp.float32)
    y = jnp.where(mask, (tn - 1).astype(jnp.float32), 0.0)

    # BCE(sigmoid(x), y) with reduced transcendental count:
    #   e = exp(-x); p = 1/(1+e); log p = -log(1+e); log(1-p) = log p - x
    e = jnp.exp(-x)
    p = 1.0 / (1.0 + e)
    lp = -jnp.log(1.0 + e)
    logp = jnp.maximum(lp, -100.0)             # PyTorch BCELoss clamps logs at -100
    log1mp = jnp.maximum(lp - x, -100.0)
    bce = -(y * logp + (1.0 - y) * log1mp)

    psig_ref[...] = p
    y_ref[...] = y
    mask_ref[...] = maskf
    bce_ref[...] = jnp.where(mask, bce, 0.0)


def _pick_tile_b(B, S, Q, budget_bytes=8 << 20):
    """Largest batch tile whose double-buffered blocks fit a conservative VMEM
    budget (sized for v7x's smaller VMEM), respecting the (8,·) sublane rule
    on the 2-D [TB, S] blocks (TB == B or TB % 8 == 0 and B % TB == 0)."""
    per_b = 2 * S * Q * 4 + 2 * S * 4 * 6      # pred (x2 buffers) + small in/out blocks
    tb = max(1, budget_bytes // max(per_b, 1))
    if tb >= B:
        return B
    tb = max(8, (tb // 8) * 8)
    while tb >= 8 and B % tb != 0:
        tb -= 8
    return tb if (tb >= 8 and B % tb == 0) else B


def kt_loss(pred, q_ids, target, *, tile_b=None):
    """pred: [B, S, Q] f32; q_ids, target: [B, S] i32 (datas[0], datas[2])."""
    B, S, Q = pred.shape
    pred = pred.astype(jnp.float32)
    q_ids = q_ids.astype(jnp.int32)
    target = target.astype(jnp.int32)

    # Time shift ([:, 1:]) done on the tiny int arrays in the wrapper; the
    # zero-padded last column always yields mask=False, so the kernel can run
    # at full, tile-aligned S.
    q_next = jnp.pad(q_ids[:, 1:], ((0, 0), (0, 1)))
    t_next = jnp.pad(target[:, 1:], ((0, 0), (0, 1)))

    tb = _pick_tile_b(B, S, Q) if tile_b is None else tile_b
    assert B % tb == 0 and (tb == B or tb % 8 == 0), (B, tb)
    grid = (B // tb,)

    bspec2d = pl.BlockSpec((tb, S), lambda i: (i, 0))
    grid_spec = pl.GridSpec(
        grid=grid,
        in_specs=(
            pl.BlockSpec((tb, S, Q), lambda i: (i, 0, 0)),
            bspec2d,
            bspec2d,
        ),
        out_specs=(bspec2d, bspec2d, bspec2d, bspec2d),
    )
    out_shape = tuple(jax.ShapeDtypeStruct((B, S), jnp.float32) for _ in range(4))

    psig, y, maskf, bce = pl.pallas_call(
        _loss_kernel,
        out_shape=out_shape,
        grid_spec=grid_spec,
        compiler_params=pltpu.CompilerParams(
            dimension_semantics=("parallel",),
            vmem_limit_bytes=32 * 1024 * 1024,
        ),
    )(pred, q_next, t_next)

    # Global reduction / division outside the kernel; guard empty mask.
    count = jnp.sum(maskf)
    loss = jnp.sum(bce) / jnp.maximum(count, 1.0)
    return loss, psig, y, maskf


def _reference(pred, q_ids, target):
    """Pure numpy reference mirroring the PyTorch forward."""
    pred = np.asarray(pred, np.float32)
    q = np.asarray(q_ids, np.int64)
    t = np.asarray(target, np.int64)
    qshft = np.maximum(q - 1, 0)
    idx = qshft[:, 1:]
    pred_first = pred[:, :-1, :]
    pred_one = np.take_along_axis(pred_first, idx[:, :, None], axis=-1)[..., 0]
    tgt = t[:, 1:]
    mask = tgt >= 1
    fp = pred_one[mask]
    ft = (tgt[mask] - 1).astype(np.float32)
    p = 1.0 / (1.0 + np.exp(-fp))
    logp = np.maximum(np.log(p), -100.0)
    log1mp = np.maximum(np.log(1.0 - p), -100.0)
    loss = float(np.mean(-(ft * logp + (1.0 - ft) * log1mp)))
    return loss, p, ft


if __name__ == "__main__":
    # small shapes consistent with the module; B=16 with tile_b=8 exercises a
    # 2-step "parallel" grid (megacore path on v7x, pipelined DMA everywhere).
    B, MAX_STEP, QUES = 16, 8, 32
    key = jax.random.PRNGKey(0)
    k1, k2, k3 = jax.random.split(key, 3)

    pred = jax.random.normal(k1, (B, MAX_STEP, QUES), dtype=jnp.float32)
    # question ids in [0, QUES]; 0 acts as padding (-> clamped index 0)
    q_ids = jax.random.randint(k2, (B, MAX_STEP), 0, QUES + 1, dtype=jnp.int32)
    # targets in {0 (pad), 1 (incorrect), 2 (correct)}
    target = jax.random.randint(k3, (B, MAX_STEP), 0, 3, dtype=jnp.int32)

    run = jax.jit(lambda p, q, t: kt_loss(p, q, t, tile_b=8))
    loss, psig, y, maskf = jax.block_until_ready(run(pred, q_ids, target))

    # host-side masked_select compaction (dynamic shape; glue, not hot path)
    mask_np = np.asarray(maskf) > 0.5
    filtered_pred = np.asarray(psig)[mask_np]
    filtered_target = np.asarray(y)[mask_np]

    ref_loss, ref_pred, ref_tgt = _reference(pred, q_ids, target)
    assert np.allclose(float(loss), ref_loss, rtol=1e-5, atol=1e-5), (float(loss), ref_loss)
    assert np.allclose(filtered_pred, ref_pred, rtol=1e-5, atol=1e-5)
    assert np.allclose(filtered_target, ref_tgt)

    print("KERNEL_OK")
</pallas_src>

<mosaic_0001>
module attributes {stable_mosaic.version = 11 : i64} {
  func.func @_loss_kernel(%arg0: i32, %arg1: memref<8x8x32xf32, #tpu.memory_space<vmem>>, %arg2: memref<8x8xi32, #tpu.memory_space<vmem>>, %arg3: memref<8x8xi32, #tpu.memory_space<vmem>>, %arg4: memref<8x8xf32, #tpu.memory_space<vmem>>, %arg5: memref<8x8xf32, #tpu.memory_space<vmem>>, %arg6: memref<8x8xf32, #tpu.memory_space<vmem>>, %arg7: memref<8x8xf32, #tpu.memory_space<vmem>>) attributes {dimension_semantics = [#tpu.dimension_semantics<parallel>], iteration_bounds = array<i64: 2>, scalar_prefetch = 0 : i64, scratch_operands = 0 : i64, tpu.core_type = #tpu.core_type<tc>, window_params = [{transform_indices = @transform_0, window_bounds = array<i64: 8, 8, 32>}, {transform_indices = @transform_1, window_bounds = array<i64: 8, 8>}, {transform_indices = @transform_2, window_bounds = array<i64: 8, 8>}, {transform_indices = @transform_3, window_bounds = array<i64: 8, 8>}, {transform_indices = @transform_4, window_bounds = array<i64: 8, 8>}, {transform_indices = @transform_5, window_bounds = array<i64: 8, 8>}, {transform_indices = @transform_6, window_bounds = array<i64: 8, 8>}]} {
    %c0 = arith.constant 0 : index
    %c0_0 = arith.constant 0 : index
    %c0_1 = arith.constant 0 : index
    %0 = vector.load %arg1[%c0, %c0_0, %c0_1] : memref<8x8x32xf32, #tpu.memory_space<vmem>>, vector<8x8x32xf32>
    %c0_2 = arith.constant 0 : index
    %c0_3 = arith.constant 0 : index
    %1 = vector.load %arg2[%c0_2, %c0_3] : memref<8x8xi32, #tpu.memory_space<vmem>>, vector<8x8xi32>
    %c0_4 = arith.constant 0 : index
    %c0_5 = arith.constant 0 : index
    %2 = vector.load %arg3[%c0_4, %c0_5] : memref<8x8xi32, #tpu.memory_space<vmem>>, vector<8x8xi32>
    %c1_i32 = arith.constant 1 : i32
    %3 = vector.broadcast %c1_i32 : i32 to vector<8x8xi32>
    %4 = arith.subi %1, %3 : vector<8x8xi32>
    %c0_i32 = arith.constant 0 : i32
    %5 = vector.broadcast %c0_i32 : i32 to vector<8x8xi32>
    %6 = arith.maxsi %4, %5 : vector<8x8xi32>
    %7 = tpu.iota {dimensions = array<i32: 2>} : vector<1x1x32xi32>
    %8 = vector.shape_cast %6 : vector<8x8xi32> to vector<8x8x1xi32>
    %9 = vector.broadcast %7 : vector<1x1x32xi32> to vector<8x8x32xi32>
    %10 = vector.broadcast %8 : vector<8x8x1xi32> to vector<8x8x32xi32>
    %11 = arith.cmpi eq, %9, %10 : vector<8x8x32xi32>
    %cst = arith.constant 0.000000e+00 : f32
    %12 = vector.broadcast %cst : f32 to vector<8x8x32xf32>
    %13 = arith.select %11, %0, %12 : vector<8x8x32xi1>, vector<8x8x32xf32>
    %cst_6 = arith.constant dense<0.000000e+00> : vector<8x8xf32>
    %14 = vector.multi_reduction <add>, %13, %cst_6 [2] : vector<8x8x32xf32> to vector<8x8xf32>
    %c1_i32_7 = arith.constant 1 : i32
    %15 = vector.broadcast %c1_i32_7 : i32 to vector<8x8xi32>
    %16 = arith.cmpi sge, %2, %15 : vector<8x8xi32>
    %17 = arith.extui %16 : vector<8x8xi1> to vector<8x8xi32>
    %18 = arith.sitofp %17 : vector<8x8xi32> to vector<8x8xf32>
    %c1_i32_8 = arith.constant 1 : i32
    %19 = vector.broadcast %c1_i32_8 : i32 to vector<8x8xi32>
    %20 = arith.subi %2, %19 : vector<8x8xi32>
    %21 = arith.sitofp %20 : vector<8x8xi32> to vector<8x8xf32>
    %cst_9 = arith.constant 0.000000e+00 : f32
    %22 = vector.broadcast %cst_9 : f32 to vector<8x8xf32>
    %23 = arith.select %16, %21, %22 : vector<8x8xi1>, vector<8x8xf32>
    %cst_10 = arith.constant 0.000000e+00 : f32
    %24 = vector.broadcast %cst_10 : f32 to vector<8x8xf32>
    %25 = arith.subf %24, %14 : vector<8x8xf32>
    %26 = math.exp %25 : vector<8x8xf32>
    %cst_11 = arith.constant 1.000000e+00 : f32
    %27 = vector.broadcast %cst_11 : f32 to vector<8x8xf32>
    %28 = arith.addf %27, %26 : vector<8x8xf32>
    %cst_12 = arith.constant 1.000000e+00 : f32
    %29 = vector.broadcast %cst_12 : f32 to vector<8x8xf32>
    %30 = arith.divf %29, %28 : vector<8x8xf32>
    %cst_13 = arith.constant 1.000000e+00 : f32
    %31 = vector.broadcast %cst_13 : f32 to vector<8x8xf32>
    %32 = arith.addf %31, %26 : vector<8x8xf32>
    %33 = math.log %32 : vector<8x8xf32>
    %cst_14 = arith.constant 0.000000e+00 : f32
    %34 = vector.broadcast %cst_14 : f32 to vector<8x8xf32>
    %35 = arith.subf %34, %33 : vector<8x8xf32>
    %cst_15 = arith.constant -1.000000e+02 : f32
    %36 = vector.broadcast %cst_15 : f32 to vector<8x8xf32>
    %37 = arith.maximumf %35, %36 : vector<8x8xf32>
    %38 = arith.subf %35, %14 : vector<8x8xf32>
    %cst_16 = arith.constant -1.000000e+02 : f32
    %39 = vector.broadcast %cst_16 : f32 to vector<8x8xf32>
    %40 = arith.maximumf %38, %39 : vector<8x8xf32>
    %41 = arith.mulf %23, %37 : vector<8x8xf32>
    %cst_17 = arith.constant 1.000000e+00 : f32
    %42 = vector.broadcast %cst_17 : f32 to vector<8x8xf32>
    %43 = arith.subf %42, %23 : vector<8x8xf32>
    %44 = arith.mulf %43, %40 : vector<8x8xf32>
    %45 = arith.addf %41, %44 : vector<8x8xf32>
    %cst_18 = arith.constant 0.000000e+00 : f32
    %46 = vector.broadcast %cst_18 : f32 to vector<8x8xf32>
    %47 = arith.subf %46, %45 : vector<8x8xf32>
    %c0_19 = arith.constant 0 : index
    %c0_20 = arith.constant 0 : index
    %48 = vector.load %arg4[%c0_19, %c0_20] : memref<8x8xf32, #tpu.memory_space<vmem>>, vector<8x8xf32>
    tpu.vector_store %arg4[%c0_19, %c0_20], %30 {strides = array<i32>} : memref<8x8xf32, #tpu.memory_space<vmem>>, vector<8x8xf32>,
    %c0_21 = arith.constant 0 : index
    %c0_22 = arith.constant 0 : index
    %49 = vector.load %arg5[%c0_21, %c0_22] : memref<8x8xf32, #tpu.memory_space<vmem>>, vector<8x8xf32>
    tpu.vector_store %arg5[%c0_21, %c0_22], %23 {strides = array<i32>} : memref<8x8xf32, #tpu.memory_space<vmem>>, vector<8x8xf32>,
    %c0_23 = arith.constant 0 : index
    %c0_24 = arith.constant 0 : index
    %50 = vector.load %arg6[%c0_23, %c0_24] : memref<8x8xf32, #tpu.memory_space<vmem>>, vector<8x8xf32>
    tpu.vector_store %arg6[%c0_23, %c0_24], %18 {strides = array<i32>} : memref<8x8xf32, #tpu.memory_space<vmem>>, vector<8x8xf32>,
    %cst_25 = arith.constant 0.000000e+00 : f32
    %51 = vector.broadcast %cst_25 : f32 to vector<8x8xf32>
    %52 = arith.select %16, %47, %51 : vector<8x8xi1>, vector<8x8xf32>
    %c0_26 = arith.constant 0 : index
    %c0_27 = arith.constant 0 : index
    %53 = vector.load %arg7[%c0_26, %c0_27] : memref<8x8xf32, #tpu.memory_space<vmem>>, vector<8x8xf32>
    tpu.vector_store %arg7[%c0_26, %c0_27], %52 {strides = array<i32>} : memref<8x8xf32, #tpu.memory_space<vmem>>, vector<8x8xf32>,
    return
  }
  func.func @transform_0(%arg0: i32) -> (i32, i32, i32) {
    %c0_i32 = arith.constant 0 : i32
    %c0_i32_0 = arith.constant 0 : i32
    %c0_i32_1 = arith.constant 0 : i32
    return %arg0, %c0_i32, %c0_i32_0 : i32, i32, i32
  }
  func.func @transform_1(%arg0: i32) -> (i32, i32) {
    %c0_i32 = arith.constant 0 : i32
    %c0_i32_0 = arith.constant 0 : i32
    return %arg0, %c0_i32 : i32, i32
  }
  func.func @transform_2(%arg0: i32) -> (i32, i32) {
    %c0_i32 = arith.constant 0 : i32
    %c0_i32_0 = arith.constant 0 : i32
    return %arg0, %c0_i32 : i32, i32
  }
  func.func @transform_3(%arg0: i32) -> (i32, i32) {
    %c0_i32 = arith.constant 0 : i32
    %c0_i32_0 = arith.constant 0 : i32
    return %arg0, %c0_i32 : i32, i32
  }
  func.func @transform_4(%arg0: i32) -> (i32, i32) {
    %c0_i32 = arith.constant 0 : i32
    %c0_i32_0 = arith.constant 0 : i32
    return %arg0, %c0_i32 : i32, i32
  }
  func.func @transform_5(%arg0: i32) -> (i32, i32) {
    %c0_i32 = arith.constant 0 : i32
    %c0_i32_0 = arith.constant 0 : i32
    return %arg0, %c0_i32 : i32, i32
  }
  func.func @transform_6(%arg0: i32) -> (i32, i32) {
    %c0_i32 = arith.constant 0 : i32
    %c0_i32_0 = arith.constant 0 : i32
    return %arg0, %c0_i32 : i32, i32
  }
}

</mosaic_0001>

<bundles_post_ra>
// kernel: _lambda_.1
= control target key start
LH: loop header
LB: loop body
LE: loop exit
PB: predicated region body
PF: predicated region fallthrough
CT: control target
= control target key end

     0   :  { %s982_s21 = smov 0   ;;  %s1165_s0 = inlined_call_operand.vmem [shape: f32[16,8,32], index: 0, kind: input, shape index: {}]   ;;  %s1166_s1 = inlined_call_operand.vmem [shape: s32[16,8], index: 1, kind: input, shape index: {}]   ;;  %s1167_s2 = inlined_call_operand.vmem [shape: s32[16,8], index: 2, kind: input, shape index: {}]   ;;  %s1168_s3 = inlined_call_operand.vmem [shape: f32[16,8], index: 3, kind: output, shape index: {0}]   ;;  %s1169_s4 = inlined_call_operand.vmem [shape: f32[16,8], index: 4, kind: output, shape index: {1}]   ;;  %s1170_s5 = inlined_call_operand.vmem [shape: f32[16,8], index: 5, kind: output, shape index: {2}]   ;;  %s1171_s6 = inlined_call_operand.vmem [shape: f32[16,8], index: 6, kind: output, shape index: {3}]  }
   0x1 LB: > { %s988_s22 = sadd.s32 4294967295, %s944_s21   ;;  %p867_p0 = scmp.ge.s32.totalorder %s944_s21, 1  ;;  %s944_s21 = sphi %s982_s21, %s17_s21  }
   0x2   : > { %p238_p1 = scmp.lt.s32.totalorder %s944_s21, 3 }
   0x4   : > { %p239_p2 = pnand %p867_p0, %p238_p1 }
   0x5   : > { %p293_p3 = scmp.lt.s32.totalorder (!%p239_p2), %s988_s22, 1  ;;  %v330_v0 = vlaneseq (!%p239_p2)  ;;  %s868_s28 = sshll.u32 (!%p239_p2), %s988_s22, 3  ;;  %vm404_vm1 = vcmask (!%p239_p2), 261120   ;;  %v946_v57 = vmov (!%p239_p2), 0.0   ;;  %vm687_vm11 = vcmask (!%p239_p2), 64512  }
   0x6   : > { %242 = sbr.rel (%p239_p2) target bundleno = 350 (0x15e), region = 32  ;;  %p288_p4 = scmp.lt.s32.totalorder (!%p239_p2), %s868_s28, 15  ;;  %vm571_vm12 = vcmask (!%p239_p2), 1041409   ;;  %vm573_vm13 = vcmask (!%p239_p2), 1042434   ;;  %vm575_vm14 = vcmask (!%p239_p2), 1043459   ;;  %vm577_vm15 = vcmask (!%p239_p2), 1044484  }
   0x7   : > { %v994_v1 = vshrl.u32 (!%p239_p2), %v330_v0, 7  ;;  %v1016_v21 = vand.u32 (!%p239_p2), 127, %v330_v0 }
   0x9   : > { %v334_v4 = vsub.s32 (!%p239_p2), 0, %v994_v1  ;;  %v348_v5 = vsub.s32 (!%p239_p2), 2, %v994_v1  ;;  %v341_v6 = vsub.s32 (!%p239_p2), 1, %v994_v1  ;;  %v355_v7 = vsub.s32 (!%p239_p2), 3, %v994_v1 }
   0xa   : > { %v362_v13 = vsub.s32 (!%p239_p2), 4, %v994_v1  ;;  %v369_v14 = vsub.s32 (!%p239_p2), 5, %v994_v1  ;;  %v376_v17 = vsub.s32 (!%p239_p2), 6, %v994_v1  ;;  %v383_v18 = vsub.s32 (!%p239_p2), 7, %v994_v1 }
   0xd   : > { %s294_s23 = scalar_select %p293_p3, %s988_s22, 1 }
   0xe   : > { %s1173_s28 = smov (!%p288_p4, %s868_s28), 15 }
   0xf   : > { %s996_s24 = sshll.u32 %s294_s23, 3  ;;  %s869_s29 = sshll.u32 %s1173_s28, 3 }
  0x10   : > { %s296_s27 = scalar_lea.vmem %s1166_s1, %s996_s24  ;;  %s1014_s8 = scalar_lea.vmem %s1165_s0, %s869_s29 }
  0x11   : > { %v325_v2 = vld [vmem:[%s296_s27] sm:$0xff]  ;;  %v319_v23 = vld [vmem:[%s1014_s8 + $0x10] sm:$0xff]  ;;  %v318_v29 = vld [vmem:[%s1014_s8 + $0x8] sm:$0xff]  ;;  %s300_s11 = scalar_lea.vmem %s1167_s2, %s996_s24  ;;  %s308_s14 = scalar_lea.vmem %s1169_s4, %s996_s24 }
  0x12   : > { %v876_v3 = vadd.s32 4294967295, %v325_v2  ;;  %v317_v22 = vld [vmem:[%s1014_s8] sm:$0xff]  ;;  %v320_v30 = vld [vmem:[%s1014_s8 + $0x18] sm:$0xff]  ;;  %v322_v38 = vld [vmem:[%s1014_s8 + $0x28] sm:$0xff]  ;;  %s312_s17 = scalar_lea.vmem %s1170_s5, %s996_s24  ;;  %s304_s20 = scalar_lea.vmem %s1168_s3, %s996_s24 }
  0x13   : > { %v321_v37 = vld [vmem:[%s1014_s8 + $0x20] sm:$0xff]  ;;  %v323_v45 = vld [vmem:[%s1014_s8 + $0x30] sm:$0xff]  ;;  %v324_v46 = vld [vmem:[%s1014_s8 + $0x38] sm:$0xff]  ;;  %s316_s25 = scalar_lea.vmem %s1171_s6, %s996_s24 }
  0x14   : > { %vm328_vm0 = vcmp.gt.s32.totalorder %v876_v3, 0  ;;  %v1046_v54 = vld [vmem:[%s300_s11] sm:$0xff] }
  0x15   : > { %v329_v8 = vsel %vm328_vm0, %v876_v3, 0  ;;  %v878_v55 = vadd.s32 4294967295, %v1046_v54  ;;  %vm429_vm10 = vcmp.ge.s32.totalorder %v1046_v54, 1  ;;  %vm579_vm0 = vcmask 1045509  }
  0x16   : > { %v335_v9 = vrot.slane %v329_v8, %v334_v4  ;;  %v349_v10 = vrot.slane %v329_v8, %v348_v5  ;;  %v342_v11 = vrot.slane %v329_v8, %v341_v6  ;;  %v356_v12 = vrot.slane %v329_v8, %v355_v7 }
  0x17   : > { %v363_v15 = vrot.slane %v329_v8, %v362_v13  ;;  %v370_v16 = vrot.slane %v329_v8, %v369_v14  ;;  %v377_v19 = vrot.slane %v329_v8, %v376_v17  ;;  %v384_v20 = vrot.slane %v329_v8, %v383_v18 }
  0x18   : > { %337 = vbcast.lane.b32.xlu0 %v335_v9, 256  ;;  %351 = vbcast.lane.b32.xlu1 %v349_v10, 256  ;;  %v433_v56 = vcvt.s32.f32 %v878_v55  ;;  %v877_v58 = vsel %vm429_vm10, 1.0, %v946_v57 }
  0x19   : > { %690 = vst.msk [vmem:[%s312_s17] sm:$0xff] %vm687_vm11, %v877_v58 }
  0x1a   : > { %v1062_v59 = vsel %vm429_vm10, %v433_v56, 0.0 }
  0x1b   : > { %689 = vst.msk [vmem:[%s308_s14] sm:$0xff] %vm687_vm11, %v1062_v59 }
  0x1c   : > { %344 = vbcast.lane.b32.xlu0 %v342_v11, 256  ;;  %358 = vbcast.lane.b32.xlu1 %v356_v12, 256 }
  0x20   : > { %365 = vbcast.lane.b32.xlu0 %v363_v15, 256  ;;  %372 = vbcast.lane.b32.xlu1 %v370_v16, 256 }
  0x24   : > { %379 = vbcast.lane.b32.xlu0 %v377_v19, 256  ;;  %386 = vbcast.lane.b32.xlu1 %v384_v20, 256 }
  0x8a   : > { %v338_v24 = vpop.permute.xlu0 %337  ;;  %v352_v25 = vpop.permute.xlu1 %351 }
  0x8b   : > { %vm388_vm2 = vcmp.eq.s32.totalorder %v1016_v21, %v338_v24  ;;  %vm390_vm3 = vcmp.eq.s32.totalorder %v1016_v21, %v352_v25 }
  0x8c   : > { %v396_v26 = vsel %vm388_vm2, %v317_v22, 0.0  ;;  %v398_v27 = vsel %vm390_vm3, %v319_v23, 0.0  ;;  %vm583_vm2 = vcmask 1047559  }
  0x8d   : > { %v405_v28 = vsel %vm404_vm1, %v396_v26, 0.0  ;;  %v411_v33 = vsel %vm404_vm1, %v398_v27, 0.0 }
  0x8e   : > { %v345_v31 = vpop.permute.xlu0 %344  ;;  %406 = vadd.xlane.f32.xlu0 %v405_v28  ;;  %v359_v32 = vpop.permute.xlu1 %358 }
  0x8f   : > { %vm389_vm4 = vcmp.eq.s32.totalorder %v1016_v21, %v345_v31  ;;  %vm391_vm5 = vcmp.eq.s32.totalorder %v1016_v21, %v359_v32 }
  0x90   : > { %v397_v34 = vsel %vm389_vm4, %v318_v29, 0.0  ;;  %v399_v35 = vsel %vm391_vm5, %v320_v30, 0.0 }
  0x91   : > { %v408_v36 = vsel %vm404_vm1, %v397_v34, 0.0  ;;  %v414_v41 = vsel %vm404_vm1, %v399_v35, 0.0 }
  0x92   : > { %v366_v39 = vpop.permute.xlu0 %365  ;;  %409 = vadd.xlane.f32.xlu1 %v408_v36  ;;  %412 = vadd.xlane.f32.xlu0 %v411_v33  ;;  %v373_v40 = vpop.permute.xlu1 %372  ;;  %v1093_v36 = vsub.s32 %v1016_v21, %v994_v1 }
  0x93   : > { %vm392_vm6 = vcmp.eq.s32.totalorder %v1016_v21, %v366_v39  ;;  %vm393_vm7 = vcmp.eq.s32.totalorder %v1016_v21, %v373_v40 }
  0x94   : > { %v400_v42 = vsel %vm392_vm6, %v321_v37, 0.0  ;;  %v401_v43 = vsel %vm393_vm7, %v322_v38, 0.0 }
  0x95   : > { %v417_v44 = vsel %vm404_vm1, %v400_v42, 0.0  ;;  %v420_v49 = vsel %vm404_vm1, %v401_v43, 0.0 }
  0x96   : > { %v380_v47 = vpop.permute.xlu0 %379  ;;  %418 = vadd.xlane.f32.xlu1 %v417_v44  ;;  %415 = vadd.xlane.f32.xlu0 %v414_v41  ;;  %v387_v48 = vpop.permute.xlu1 %386 }
  0x97   : > { %vm394_vm8 = vcmp.eq.s32.totalorder %v1016_v21, %v380_v47  ;;  %vm395_vm9 = vcmp.eq.s32.totalorder %v1016_v21, %v387_v48 }
  0x98   : > { %v402_v50 = vsel %vm394_vm8, %v323_v45, 0.0  ;;  %v403_v51 = vsel %vm395_vm9, %v324_v46, 0.0 }
  0x99   : > { %v423_v52 = vsel %vm404_vm1, %v402_v50, 0.0  ;;  %v426_v53 = vsel %vm404_vm1, %v403_v51, 0.0  ;;  %vm581_vm1 = vcmask 1046534  }
  0x9a   : > { %424 = vadd.xlane.f32.xlu1 %v423_v52  ;;  %421 = vadd.xlane.f32.xlu0 %v420_v49 }
  0x9e   : > { %427 = vadd.xlane.f32.xlu0 %v426_v53 }
 0x11b   : > { %v1067_v60 = vpop.xlane.xlu0 %406 }
 0x11c   : > { %v435_v61 = vsub.f32 0.0, %v1067_v60 }
 0x11e   : > { %v443_v62 = vmul.f32 1.442695, %v435_v61 }
 0x11f   : > { %v1070_v63 = vpop.xlane.xlu1 %409  ;;  %v1072_v0 = vpop.xlane.xlu0 %412 }
 0x120   : > { %890 = vpow2.f32 %v443_v62  ;;  %v436_v2 = vsub.f32 0.0, %v1070_v63  ;;  %v437_v3 = vsub.f32 0.0, %v1072_v0 }
 0x122   : > { %v445_v4 = vmul.f32 1.442695, %v436_v2  ;;  %v447_v5 = vmul.f32 1.442695, %v437_v3 }
 0x123   : > { %v1076_v6 = vpop.xlane.xlu1 %418  ;;  %v1078_v7 = vpop.xlane.xlu0 %415 }
 0x124   : > { %892 = vpow2.f32 %v445_v4  ;;  %v439_v8 = vsub.f32 0.0, %v1076_v6  ;;  %v438_v9 = vsub.f32 0.0, %v1078_v7 }
 0x125   : > { %894 = vpow2.f32 %v447_v5 }
 0x126   : > { %v451_v10 = vmul.f32 1.442695, %v439_v8  ;;  %v449_v11 = vmul.f32 1.442695, %v438_v9 }
 0x127   : > { %v1082_v12 = vpop.xlane.xlu1 %424  ;;  %v1084_v13 = vpop.xlane.xlu0 %421 }
 0x128   : > { %896 = vpow2.f32 %v451_v10  ;;  %v441_v14 = vsub.f32 0.0, %v1082_v12  ;;  %v440_v15 = vsub.f32 0.0, %v1084_v13 }
 0x129   : > { %898 = vpow2.f32 %v449_v11 }
 0x12a   : > { %v891_v16 = vpop.eup %890  ;;  %v455_v17 = vmul.f32 1.442695, %v441_v14  ;;  %v453_v19 = vmul.f32 1.442695, %v440_v15 }
 0x12b   : > { %v459_v18 = vadd.f32 1.0, %v891_v16  ;;  %v1088_v20 = vpop.xlane.xlu0 %427 }
 0x12c   : > { %900 = vpow2.f32 %v455_v17  ;;  %v442_v22 = vsub.f32 0.0, %v1088_v20 }
 0x12d   : > { %902 = vrcp.f32 %v459_v18 }
 0x12e   : > { %v893_v23 = vpop.eup %892  ;;  %904 = vlog2.f32 %v459_v18  ;;  %v457_v24 = vmul.f32 1.442695, %v442_v22 }
 0x12f   : > { %v895_v25 = vpop.eup %894  ;;  %v460_v26 = vadd.f32 1.0, %v893_v23  ;;  %906 = vpow2.f32 %v453_v19 }
 0x130   : > { %v461_v27 = vadd.f32 1.0, %v895_v25  ;;  %908 = vpow2.f32 %v457_v24 }
 0x131   : > { %910 = vrcp.f32 %v460_v26 }
 0x132   : > { %v897_v28 = vpop.eup %896  ;;  %912 = vlog2.f32 %v460_v26 }
 0x133   : > { %v899_v29 = vpop.eup %898  ;;  %914 = vrcp.f32 %v461_v27  ;;  %v463_v30 = vadd.f32 1.0, %v897_v28 }
 0x134   : > { %916 = vlog2.f32 %v461_v27  ;;  %v462_v31 = vadd.f32 1.0, %v899_v29 }
 0x135   : > { %918 = vrcp.f32 %v463_v30 }
 0x136   : > { %v901_v32 = vpop.eup %900  ;;  %920 = vlog2.f32 %v463_v30 }
 0x137   : > { %v903_v33 = vpop.eup %902  ;;  %922 = vrcp.f32 %v462_v31  ;;  %v465_v34 = vadd.f32 1.0, %v901_v32 }
 0x138   : > { %v905_v35 = vpop.eup %904  ;;  %924 = vlog2.f32 %v462_v31  ;;  %v650_v45 = vrot.slane %v903_v33, %v1093_v36 }
 0x139   : > { %v907_v37 = vpop.eup %906  ;;  %v484_v38 = vmul.f32 0.6931472, %v905_v35  ;;  %926 = vrcp.f32 %v465_v34 }
 0x13a   : > { %v909_v39 = vpop.eup %908  ;;  %928 = vlog2.f32 %v465_v34  ;;  %v464_v40 = vadd.f32 1.0, %v907_v37 }
 0x13b   : > { %v911_v41 = vpop.eup %910  ;;  %v499_v42 = vsub.f32 0.0, %v484_v38  ;;  %v466_v43 = vadd.f32 1.0, %v909_v39 }
 0x13c   : > { %v913_v44 = vpop.eup %912  ;;  %v654_v46 = vrot.slane %v911_v41, %v1093_v36  ;;  %930 = vrcp.f32 %v464_v40 }
 0x13d   : > { %v915_v47 = vpop.eup %914  ;;  %v507_v1 = vmax.f32 %v499_v42, -100.0  ;;  %v515_v21 = vsub.f32 %v499_v42, %v1067_v60  ;;  %v486_v48 = vmul.f32 0.6931472, %v913_v44  ;;  %932 = vlog2.f32 %v464_v40 }
 0x13e   : > { %v917_v49 = vpop.eup %916  ;;  %v658_v50 = vrot.slane %v915_v47, %v1093_v36  ;;  %934 = vrcp.f32 %v466_v43  ;;  %v679_v53 = vsel %vm571_vm12, %v654_v46, %v650_v45 }
 0x13f   : > { %v919_v51 = vpop.eup %918  ;;  %v500_v52 = vsub.f32 0.0, %v486_v48  ;;  %v488_v55 = vmul.f32 0.6931472, %v917_v49  ;;  %v523_v57 = vmax.f32 %v515_v21, -100.0  ;;  %936 = vlog2.f32 %v466_v43 }
 0x140   : > { %v921_v56 = vpop.eup %920  ;;  %v542_v60 = vrot.slane %v507_v1, %v1093_v36  ;;  %v680_v4 = vsel %vm573_vm13, %v658_v50, %v679_v53  ;;  %v666_v8 = vrot.slane %v919_v51, %v1093_v36 }
 0x141   : > { %v923_v58 = vpop.eup %922  ;;  %v508_v61 = vmax.f32 %v500_v52, -100.0  ;;  %v516_v62 = vsub.f32 %v500_v52, %v1070_v63  ;;  %v501_v2 = vsub.f32 0.0, %v488_v55  ;;  %v492_v5 = vmul.f32 0.6931472, %v921_v56 }
 0x142   : > { %v925_v3 = vpop.eup %924  ;;  %v662_v9 = vrot.slane %v923_v58, %v1093_v36  ;;  %v599_v63 = vrot.slane %v523_v57, %v1093_v36 }
 0x143   : > { %v927_v10 = vpop.eup %926  ;;  %v524_v11 = vmax.f32 %v516_v62, -100.0  ;;  %v546_v14 = vrot.slane %v508_v61, %v1093_v36  ;;  %v509_v15 = vmax.f32 %v501_v2, -100.0  ;;  %v517_v16 = vsub.f32 %v501_v2, %v1072_v0 }
 0x144   : > { %v929_v17 = vpop.eup %928  ;;  %v503_v18 = vsub.f32 0.0, %v492_v5  ;;  %v490_v19 = vmul.f32 0.6931472, %v925_v3  ;;  %v681_v22 = vsel %vm575_vm14, %v662_v9, %v680_v4  ;;  %v674_v34 = vrot.slane %v927_v10, %v1093_v36 }
 0x145   : > { %v572_v23 = vsel %vm571_vm12, %v546_v14, %v542_v60  ;;  %v603_v24 = vrot.slane %v524_v11, %v1093_v36  ;;  %v525_v25 = vmax.f32 %v517_v16, -100.0  ;;  %v550_v26 = vrot.slane %v509_v15, %v1093_v36 }
 0x146   : > { %v931_v27 = vpop.eup %930  ;;  %v511_v28 = vmax.f32 %v503_v18, -100.0  ;;  %v519_v29 = vsub.f32 %v503_v18, %v1076_v6  ;;  %v502_v30 = vsub.f32 0.0, %v490_v19  ;;  %v496_v0 = vmul.f32 0.6931472, %v929_v17 }
 0x147   : > { %v933_v31 = vpop.eup %932  ;;  %v628_v32 = vsel %vm571_vm12, %v603_v24, %v599_v63  ;;  %v574_v33 = vsel %vm573_vm13, %v550_v26, %v572_v23  ;;  %v607_v37 = vrot.slane %v525_v25, %v1093_v36  ;;  %v682_v40 = vsel %vm577_vm15, %v666_v8, %v681_v22 }
 0x148   : > { %v935_v35 = vpop.eup %934  ;;  %v510_v38 = vmax.f32 %v502_v30, -100.0  ;;  %v518_v39 = vsub.f32 %v502_v30, %v1078_v7  ;;  %v527_v6 = vmax.f32 %v519_v29, -100.0  ;;  %v505_v41 = vsub.f32 0.0, %v496_v0 }
 0x149   : > { %v494_v42 = vmul.f32 0.6931472, %v933_v31  ;;  %v670_v43 = vrot.slane %v931_v27, %v1093_v36  ;;  %v937_v44 = vpop.eup %936  ;;  %v558_v45 = vrot.slane %v511_v28, %v1093_v36  ;;  %v678_v1 = vrot.slane %v935_v35, %v1093_v36 }
 0x14a   : > { %v526_v46 = vmax.f32 %v518_v39, -100.0  ;;  %v554_v47 = vrot.slane %v510_v38, %v1093_v36  ;;  %v513_v21 = vmax.f32 %v505_v41, -100.0  ;;  %v521_v48 = vsub.f32 %v505_v41, %v1082_v12 }
 0x14b   : > { %v504_v7 = vsub.f32 0.0, %v494_v42  ;;  %v683_v49 = vsel %vm579_vm0, %v670_v43, %v682_v40  ;;  %v498_v52 = vmul.f32 0.6931472, %v937_v44  ;;  %v629_v57 = vsel %vm573_vm13, %v607_v37, %v628_v32 }
 0x14c   : > { %v576_v50 = vsel %vm575_vm14, %v554_v47, %v574_v33  ;;  %v611_v51 = vrot.slane %v526_v46, %v1093_v36  ;;  %v529_v53 = vmax.f32 %v521_v48, -100.0  ;;  %v684_v56 = vsel %vm581_vm1, %v674_v34, %v683_v49 }
 0x14d   : > { %v512_v55 = vmax.f32 %v504_v7, -100.0  ;;  %v520_v12 = vsub.f32 %v504_v7, %v1084_v13  ;;  %v506_v58 = vsub.f32 0.0, %v498_v52  ;;  %v685_v60 = vsel %vm583_vm2, %v678_v1, %v684_v56 }
 0x14e   : > { %v615_v61 = vrot.slane %v527_v6, %v1093_v36  ;;  %v566_v62 = vrot.slane %v513_v21, %v1093_v36  ;;  %v578_v2 = vsel %vm577_vm15, %v558_v45, %v576_v50  ;;  %688 = vst.msk [vmem:[%s304_s20] sm:$0xff] %vm687_vm11, %v685_v60  ;;  %v630_v4 = vsel %vm575_vm14, %v611_v51, %v629_v57 }
 0x14f   : > { %v562_v3 = vrot.slane %v512_v55, %v1093_v36  ;;  %v528_v5 = vmax.f32 %v520_v12, -100.0  ;;  %v514_v8 = vmax.f32 %v506_v58, -100.0  ;;  %v522_v9 = vsub.f32 %v506_v58, %v1088_v20 }
 0x150   : > { %v623_v13 = vrot.slane %v529_v53, %v1093_v36  ;;  %v631_v16 = vsel %vm577_vm15, %v615_v61, %v630_v4  ;;  %v587_v63 = vsub.f32 1.0, %v1062_v59 }
 0x151   : > { %v580_v10 = vsel %vm579_vm0, %v562_v3, %v578_v2  ;;  %v619_v11 = vrot.slane %v528_v5, %v1093_v36  ;;  %v530_v14 = vmax.f32 %v522_v9, -100.0  ;;  %v570_v15 = vrot.slane %v514_v8, %v1093_v36 }
 0x152   : > { %v582_v17 = vsel %vm581_vm1, %v566_v62, %v580_v10 }
 0x153   : > { %v632_v18 = vsel %vm579_vm0, %v619_v11, %v631_v16  ;;  %v584_v20 = vsel %vm583_vm2, %v570_v15, %v582_v17  ;;  %v627_v19 = vrot.slane %v530_v14, %v1093_v36 }
 0x154   : > { %v633_v22 = vsel %vm581_vm1, %v623_v13, %v632_v18  ;;  %v586_v24 = vmul.f32 %v584_v20, %v1062_v59 }
 0x155   : > { %v634_v23 = vsel %vm583_vm2, %v627_v19, %v633_v22 }
 0x156   : > { %v636_v25 = vmul.f32 %v634_v23, %v587_v63 }
 0x158   : > { %v637_v26 = vadd.f32 %v636_v25, %v586_v24 }
 0x15a   : > { %v638_v27 = vsub.f32 0.0, %v637_v26 }
 0x15c   : > { %v691_v28 = vsel %vm429_vm10, %v638_v27, 0.0 }
 0x15d   : > { %692 = vst.msk [vmem:[%s316_s25] sm:$0xff] %vm687_vm11, %v691_v28 }
 0x15e PF: > { %s17_s21 = sadd.s32 1, %s944_s21  }
 0x15f   : > { %p14_p5 = scmp.ge.s32.totalorder %s17_s21, 4  }
 0x161   :  { %16 = sbr.rel (!%p14_p5) target bundleno = 1 (0x1), region = 104 }

</bundles_post_ra>
